<compile_context>
chip_gen: v6e
topology: v6e:2x2x1
jax: 0.10.0
libtpu: 0.0.40
codegen_flags: <defaults>
</compile_context>

<pallas_src>
import functools

import jax
import jax.numpy as jnp
from jax.experimental import pallas as pl
from jax.experimental.pallas import tpu as pltpu


def _round_up(n, m):
    return (n + m - 1) // m * m


def kelly_mlp_kernel(xT_ref, w1_ref, b1_ref, w2_ref, b2_ref,
                     w3_ref, b3_ref, w4_ref, b4_ref, o_ref, *, sub):
    tb = xT_ref.shape[1]
    # Statically-unrolled sub-tile loop over the lane (batch) axis; slice starts
    # are Python constants so every load/store is an aligned full-vreg access.
    for j in range(tb // sub):
        x = xT_ref[:, pl.ds(j * sub, sub)]                      # (IN, sub) bf16
        # fc1 + relu   (dropout(0.3) -> identity at inference)
        h = jnp.dot(w1_ref[...], x, preferred_element_type=jnp.float32)
        h = jnp.maximum(h + b1_ref[...], 0.0)                   # (128, sub) f32
        # fc2 + relu
        h = jnp.dot(w2_ref[...], h.astype(jnp.bfloat16),
                    preferred_element_type=jnp.float32)
        h = jnp.maximum(h + b2_ref[...], 0.0)                   # (64, sub) f32
        # fc3 + relu
        h = jnp.dot(w3_ref[...], h.astype(jnp.bfloat16),
                    preferred_element_type=jnp.float32)
        h = jnp.maximum(h + b3_ref[...], 0.0)                   # (32, sub) f32
        # fc4 (out width 1): VPU multiply + XLU sublane reduce, skip the MXU.
        z = jnp.sum(h * w4_ref[...], axis=0, keepdims=True) + b4_ref[...]
        # sigmoid(z) * 0.5 ; exp and approx reciprocal both run on the EUP.
        out = 0.5 * pl.reciprocal(1.0 + jnp.exp(-z), approx=True)   # (1, sub)
        o_ref[:, pl.ds(j * sub, sub)] = out.astype(o_ref.dtype)


def kelly_fraction_net(x, params, *, sub=256, max_tb=1024):
    """x: [B, input_size] float32.
    params: dict name -> (w [out,in] f32, b [out,1] f32)  (PyTorch Linear layout).
    Returns [B, 1] float32 == sigmoid(fc4(relu(fc3(relu(fc2(relu(fc1 x))))))) * 0.5.
    """
    B, in_size = x.shape
    w1, b1 = params["fc1"]
    w2, b2 = params["fc2"]
    w3, b3 = params["fc3"]
    w4, b4 = params["fc4"]

    # Batch tile: multiple of `sub`, capped so double-buffered x/out tiles plus
    # resident weights stay far below even v7x's 32 MiB default scoped VMEM.
    tb = min(max_tb, _round_up(max(B, 1), sub))
    b_pad = _round_up(B, tb)
    grid = (b_pad // tb,)

    # Feature-major bf16 x stream; transpose + cast + pad fuse into one XLA pass.
    xT = jnp.pad(x.T.astype(jnp.bfloat16), ((0, 0), (0, b_pad - B)))

    # bf16 weights for the MXU layers; fc4 weight stays f32 (VPU path).
    w1b = w1.astype(jnp.bfloat16)          # (128, IN)
    w2b = w2.astype(jnp.bfloat16)          # (64, 128)
    w3b = w3.astype(jnp.bfloat16)          # (32, 64)
    w4c = w4.T                             # (32, 1) f32
    # biases b1,b2,b3,b4 are (out, 1) f32 -> lane-broadcast inside the kernel.

    resident = lambda a: pl.BlockSpec(a.shape, lambda i: (0, 0))
    kernel = functools.partial(kelly_mlp_kernel, sub=sub)

    out = pl.pallas_call(
        kernel,
        out_shape=jax.ShapeDtypeStruct((1, b_pad), jnp.float32),
        grid_spec=pltpu.PrefetchScalarGridSpec(
            num_scalar_prefetch=0,
            grid=grid,
            in_specs=[
                pl.BlockSpec((in_size, tb), lambda i: (0, i)),   # x stream
                resident(w1b), resident(b1),
                resident(w2b), resident(b2),
                resident(w3b), resident(b3),
                resident(w4c), resident(b4),
            ],
            out_specs=pl.BlockSpec((1, tb), lambda i: (0, i)),
        ),
        compiler_params=pltpu.CompilerParams(
            dimension_semantics=("parallel",)),
    )(xT, w1b, b1, w2b, b2, w3b, b3, w4c, b4)

    return out[0, :B].reshape(B, 1)


def init_params(key, input_size):
    """Deterministic init mimicking nn.Linear (uniform +-1/sqrt(fan_in)).
    Weights in PyTorch (out, in) layout; biases as (out, 1)."""
    dims = [(input_size, 128), (128, 64), (64, 32), (32, 1)]
    names = ["fc1", "fc2", "fc3", "fc4"]
    params = {}
    for name, (din, dout) in zip(names, dims):
        key, kw, kb = jax.random.split(key, 3)
        bound = 1.0 / (din ** 0.5)
        w = jax.random.uniform(kw, (dout, din), jnp.float32, -bound, bound)
        b = jax.random.uniform(kb, (dout, 1), jnp.float32, -bound, bound)
        params[name] = (w, b)
    return params


def reference_forward(x, params):
    """Pure-JAX f32 reference of the PyTorch forward (eval mode)."""
    h = x
    for name in ["fc1", "fc2", "fc3"]:
        w, b = params[name]
        h = jnp.maximum(h @ w.T + b[:, 0], 0.0)
    w, b = params["fc4"]
    return jax.nn.sigmoid(h @ w.T + b[:, 0]) * 0.5


if __name__ == "__main__":
    key = jax.random.PRNGKey(0)
    input_size = 32
    batch = 8

    kx, kp = jax.random.split(key)
    x = jax.random.normal(kx, (batch, input_size), jnp.float32)
    params = init_params(kp, input_size)

    out = jax.block_until_ready(kelly_fraction_net(x, params))
    ref = reference_forward(x, params)

    assert out.shape == (batch, 1)
    # bf16 MXU inputs + approx reciprocal -> loosened tolerance vs f32 reference.
    assert jnp.allclose(out, ref, atol=2e-2, rtol=0.0), "mismatch vs reference"

    print("KERNEL_OK")
</pallas_src>

<mosaic_0001>
module attributes {stable_mosaic.version = 11 : i64} {
  func.func @kelly_mlp_kernel(%arg0: i32, %arg1: memref<32x256xbf16, #tpu.memory_space<vmem>>, %arg2: memref<128x32xbf16, #tpu.memory_space<vmem>>, %arg3: memref<128x1xf32, #tpu.memory_space<vmem>>, %arg4: memref<64x128xbf16, #tpu.memory_space<vmem>>, %arg5: memref<64x1xf32, #tpu.memory_space<vmem>>, %arg6: memref<32x64xbf16, #tpu.memory_space<vmem>>, %arg7: memref<32x1xf32, #tpu.memory_space<vmem>>, %arg8: memref<32x1xf32, #tpu.memory_space<vmem>>, %arg9: memref<1x1xf32, #tpu.memory_space<vmem>>, %arg10: memref<1x256xf32, #tpu.memory_space<vmem>>) attributes {dimension_semantics = [#tpu.dimension_semantics<parallel>], iteration_bounds = array<i64: 1>, scalar_prefetch = 0 : i64, scratch_operands = 0 : i64, tpu.core_type = #tpu.core_type<tc>, window_params = [{transform_indices = @transform_0, window_bounds = array<i64: 32, 256>}, {pipeline_mode = #tpu.pipeline_mode<synchronous>, transform_indices = @transform_1, window_bounds = array<i64: 128, 32>}, {pipeline_mode = #tpu.pipeline_mode<synchronous>, transform_indices = @transform_2, window_bounds = array<i64: 128, 1>}, {pipeline_mode = #tpu.pipeline_mode<synchronous>, transform_indices = @transform_3, window_bounds = array<i64: 64, 128>}, {pipeline_mode = #tpu.pipeline_mode<synchronous>, transform_indices = @transform_4, window_bounds = array<i64: 64, 1>}, {pipeline_mode = #tpu.pipeline_mode<synchronous>, transform_indices = @transform_5, window_bounds = array<i64: 32, 64>}, {pipeline_mode = #tpu.pipeline_mode<synchronous>, transform_indices = @transform_6, window_bounds = array<i64: 32, 1>}, {pipeline_mode = #tpu.pipeline_mode<synchronous>, transform_indices = @transform_7, window_bounds = array<i64: 32, 1>}, {pipeline_mode = #tpu.pipeline_mode<synchronous>, transform_indices = @transform_8, window_bounds = array<i64: 1, 1>}, {transform_indices = @transform_9, window_bounds = array<i64: 1, 256>}]} {
    %c0 = arith.constant 0 : index
    %c0_0 = arith.constant 0 : index
    %0 = vector.load %arg1[%c0, %c0_0] : memref<32x256xbf16, #tpu.memory_space<vmem>>, vector<32x256xbf16>
    %c0_1 = arith.constant 0 : index
    %c0_2 = arith.constant 0 : index
    %1 = vector.load %arg2[%c0_1, %c0_2] : memref<128x32xbf16, #tpu.memory_space<vmem>>, vector<128x32xbf16>
    %cst = arith.constant dense<0.000000e+00> : vector<128x256xf32>
    %2 = tpu.matmul %1, %0, %cst {dimension_numbers = #tpu.dot_dimension_numbers<[1], [0], [0], [1], [0, 0, 1, 1], [], []>} : vector<128x32xbf16>, vector<32x256xbf16>, vector<128x256xf32> -> vector<128x256xf32>
    %c0_3 = arith.constant 0 : index
    %c0_4 = arith.constant 0 : index
    %3 = vector.load %arg3[%c0_3, %c0_4] : memref<128x1xf32, #tpu.memory_space<vmem>>, vector<128x1xf32>
    %4 = vector.broadcast %3 : vector<128x1xf32> to vector<128x256xf32>
    %5 = arith.addf %2, %4 : vector<128x256xf32>
    %cst_5 = arith.constant 0.000000e+00 : f32
    %6 = vector.broadcast %cst_5 : f32 to vector<128x256xf32>
    %7 = arith.maximumf %5, %6 : vector<128x256xf32>
    %c0_6 = arith.constant 0 : index
    %c0_7 = arith.constant 0 : index
    %8 = vector.load %arg4[%c0_6, %c0_7] : memref<64x128xbf16, #tpu.memory_space<vmem>>, vector<64x128xbf16>
    %9 = arith.truncf %7 : vector<128x256xf32> to vector<128x256xbf16>
    %cst_8 = arith.constant dense<0.000000e+00> : vector<64x256xf32>
    %10 = tpu.matmul %8, %9, %cst_8 {dimension_numbers = #tpu.dot_dimension_numbers<[1], [0], [0], [1], [0, 0, 1, 1], [], []>} : vector<64x128xbf16>, vector<128x256xbf16>, vector<64x256xf32> -> vector<64x256xf32>
    %c0_9 = arith.constant 0 : index
    %c0_10 = arith.constant 0 : index
    %11 = vector.load %arg5[%c0_9, %c0_10] : memref<64x1xf32, #tpu.memory_space<vmem>>, vector<64x1xf32>
    %12 = vector.broadcast %11 : vector<64x1xf32> to vector<64x256xf32>
    %13 = arith.addf %10, %12 : vector<64x256xf32>
    %cst_11 = arith.constant 0.000000e+00 : f32
    %14 = vector.broadcast %cst_11 : f32 to vector<64x256xf32>
    %15 = arith.maximumf %13, %14 : vector<64x256xf32>
    %c0_12 = arith.constant 0 : index
    %c0_13 = arith.constant 0 : index
    %16 = vector.load %arg6[%c0_12, %c0_13] : memref<32x64xbf16, #tpu.memory_space<vmem>>, vector<32x64xbf16>
    %17 = arith.truncf %15 : vector<64x256xf32> to vector<64x256xbf16>
    %cst_14 = arith.constant dense<0.000000e+00> : vector<32x256xf32>
    %18 = tpu.matmul %16, %17, %cst_14 {dimension_numbers = #tpu.dot_dimension_numbers<[1], [0], [0], [1], [0, 0, 1, 1], [], []>} : vector<32x64xbf16>, vector<64x256xbf16>, vector<32x256xf32> -> vector<32x256xf32>
    %c0_15 = arith.constant 0 : index
    %c0_16 = arith.constant 0 : index
    %19 = vector.load %arg7[%c0_15, %c0_16] : memref<32x1xf32, #tpu.memory_space<vmem>>, vector<32x1xf32>
    %20 = vector.broadcast %19 : vector<32x1xf32> to vector<32x256xf32>
    %21 = arith.addf %18, %20 : vector<32x256xf32>
    %cst_17 = arith.constant 0.000000e+00 : f32
    %22 = vector.broadcast %cst_17 : f32 to vector<32x256xf32>
    %23 = arith.maximumf %21, %22 : vector<32x256xf32>
    %c0_18 = arith.constant 0 : index
    %c0_19 = arith.constant 0 : index
    %24 = vector.load %arg8[%c0_18, %c0_19] : memref<32x1xf32, #tpu.memory_space<vmem>>, vector<32x1xf32>
    %25 = vector.broadcast %24 : vector<32x1xf32> to vector<32x256xf32>
    %26 = arith.mulf %23, %25 : vector<32x256xf32>
    %cst_20 = arith.constant dense<0.000000e+00> : vector<256xf32>
    %27 = vector.multi_reduction <add>, %26, %cst_20 [0] : vector<32x256xf32> to vector<256xf32>
    %28 = vector.shape_cast %27 : vector<256xf32> to vector<1x256xf32>
    %c0_21 = arith.constant 0 : index
    %c0_22 = arith.constant 0 : index
    %29 = vector.load %arg9[%c0_21, %c0_22] : memref<1x1xf32, #tpu.memory_space<vmem>>, vector<1x1xf32>
    %30 = vector.broadcast %29 : vector<1x1xf32> to vector<1x256xf32>
    %31 = arith.addf %28, %30 : vector<1x256xf32>
    %cst_23 = arith.constant 0.000000e+00 : f32
    %32 = vector.broadcast %cst_23 : f32 to vector<1x256xf32>
    %33 = arith.subf %32, %31 : vector<1x256xf32>
    %34 = math.exp %33 : vector<1x256xf32>
    %cst_24 = arith.constant 1.000000e+00 : f32
    %35 = vector.broadcast %cst_24 : f32 to vector<1x256xf32>
    %36 = arith.addf %35, %34 : vector<1x256xf32>
    %37 = tpu.reciprocal %36 {approx = true} : vector<1x256xf32> -> vector<1x256xf32>
    %cst_25 = arith.constant 5.000000e-01 : f32
    %38 = vector.broadcast %cst_25 : f32 to vector<1x256xf32>
    %39 = arith.mulf %38, %37 : vector<1x256xf32>
    %c0_26 = arith.constant 0 : index
    %c0_27 = arith.constant 0 : index
    %40 = vector.load %arg10[%c0_26, %c0_27] : memref<1x256xf32, #tpu.memory_space<vmem>>, vector<1x256xf32>
    tpu.vector_store %arg10[%c0_26, %c0_27], %39 {strides = array<i32>} : memref<1x256xf32, #tpu.memory_space<vmem>>, vector<1x256xf32>,
    return
  }
  func.func @transform_0(%arg0: i32) -> (i32, i32) {
    %c0_i32 = arith.constant 0 : i32
    %c0_i32_0 = arith.constant 0 : i32
    return %c0_i32, %arg0 : i32, i32
  }
  func.func @transform_1(%arg0: i32) -> (i32, i32) {
    %c0_i32 = arith.constant 0 : i32
    %c0_i32_0 = arith.constant 0 : i32
    %c0_i32_1 = arith.constant 0 : i32
    return %c0_i32, %c0_i32_0 : i32, i32
  }
  func.func @transform_2(%arg0: i32) -> (i32, i32) {
    %c0_i32 = arith.constant 0 : i32
    %c0_i32_0 = arith.constant 0 : i32
    %c0_i32_1 = arith.constant 0 : i32
    return %c0_i32, %c0_i32_0 : i32, i32
  }
  func.func @transform_3(%arg0: i32) -> (i32, i32) {
    %c0_i32 = arith.constant 0 : i32
    %c0_i32_0 = arith.constant 0 : i32
    %c0_i32_1 = arith.constant 0 : i32
    return %c0_i32, %c0_i32_0 : i32, i32
  }
  func.func @transform_4(%arg0: i32) -> (i32, i32) {
    %c0_i32 = arith.constant 0 : i32
    %c0_i32_0 = arith.constant 0 : i32
    %c0_i32_1 = arith.constant 0 : i32
    return %c0_i32, %c0_i32_0 : i32, i32
  }
  func.func @transform_5(%arg0: i32) -> (i32, i32) {
    %c0_i32 = arith.constant 0 : i32
    %c0_i32_0 = arith.constant 0 : i32
    %c0_i32_1 = arith.constant 0 : i32
    return %c0_i32, %c0_i32_0 : i32, i32
  }
  func.func @transform_6(%arg0: i32) -> (i32, i32) {
    %c0_i32 = arith.constant 0 : i32
    %c0_i32_0 = arith.constant 0 : i32
    %c0_i32_1 = arith.constant 0 : i32
    return %c0_i32, %c0_i32_0 : i32, i32
  }
  func.func @transform_7(%arg0: i32) -> (i32, i32) {
    %c0_i32 = arith.constant 0 : i32
    %c0_i32_0 = arith.constant 0 : i32
    %c0_i32_1 = arith.constant 0 : i32
    return %c0_i32, %c0_i32_0 : i32, i32
  }
  func.func @transform_8(%arg0: i32) -> (i32, i32) {
    %c0_i32 = arith.constant 0 : i32
    %c0_i32_0 = arith.constant 0 : i32
    %c0_i32_1 = arith.constant 0 : i32
    return %c0_i32, %c0_i32_0 : i32, i32
  }
  func.func @transform_9(%arg0: i32) -> (i32, i32) {
    %c0_i32 = arith.constant 0 : i32
    %c0_i32_0 = arith.constant 0 : i32
    return %c0_i32, %arg0 : i32, i32
  }
}

</mosaic_0001>

<bundles_post_ra>
// kernel: tpu_custom_call.1
= control target key start
LH: loop header
LB: loop body
LE: loop exit
PB: predicated region body
PF: predicated region fallthrough
CT: control target
= control target key end

     0   :  { %s1183_s0 = inlined_call_operand.vmem [shape: bf16[32,256], index: 0, kind: input, shape index: {}]   ;;  %s1184_s1 = inlined_call_operand.vmem [shape: bf16[128,32], index: 1, kind: input, shape index: {}]   ;;  %s1185_s2 = inlined_call_operand.vmem [shape: f32[128,1], index: 2, kind: input, shape index: {}]   ;;  %s1186_s3 = inlined_call_operand.vmem [shape: bf16[64,128], index: 3, kind: input, shape index: {}]   ;;  %s1187_s4 = inlined_call_operand.vmem [shape: f32[64,1], index: 4, kind: input, shape index: {}]   ;;  %s1188_s5 = inlined_call_operand.vmem [shape: bf16[32,64], index: 5, kind: input, shape index: {}]   ;;  %s1189_s6 = inlined_call_operand.vmem [shape: f32[32,1], index: 6, kind: input, shape index: {}]   ;;  %s1190_s7 = inlined_call_operand.vmem [shape: f32[32,1], index: 7, kind: input, shape index: {}]   ;;  %s1191_s8 = inlined_call_operand.<no memory space> [shape: f32[1,1], index: 8, kind: input, shape index: {}]   ;;  %s1192_s9 = inlined_call_operand.hbm [shape: f32[1,256], index: 9, kind: output, shape index: {}]  }
   0x1   :  { %v14_v0 = vstv %s1191_s8 }
   0x2   :  { %15 = vst [vmem:[#allocation2] sm:$0x1] %v14_v0 }
   0x3   :  { %v825_v1 = vld [vmem:[%s1183_s0 + $0x14] ss:$8 sps:$4 sm:$0xff]   ;;  %v827_v2 = vld [vmem:[%s1183_s0 + $0x10] ss:$8 sps:$4 sm:$0xff]   ;;  %v875_v3 = vmov 0   ;;  %v831_v6 = vld [vmem:[%s1184_s1] sm:$0xff]  }
   0x4   :  { %269 = vmatprep.mubr.bf16.mxu0 %v875_v3  ;;  %823 = vset.pattern.permute.xlu0 %v875_v3  ;;  %v828_v4 = vld [vmem:[%s1183_s0 + $0x4] ss:$8 sps:$4 sm:$0xff]   ;;  %v830_v5 = vld [vmem:[%s1183_s0] ss:$8 sps:$4 sm:$0xff]   ;;  %vm212_vm0 = vcmask 261120   ;;  %v70_v7 = vld [vmem:[%s1185_s2 + $0x70] sm:$0xff] }
   0x5   :  { %249 = vmatprep.subr.bf16.mxu0 %v825_v1  ;;  %824 = vset.pattern.permute.xlu1 %v875_v3  ;;  %v68_v8 = vld [vmem:[%s1185_s2 + $0x60] sm:$0xff]  ;;  %v71_v9 = vld [vmem:[%s1185_s2 + $0x78] sm:$0xff]  ;;  %v69_v10 = vld [vmem:[%s1185_s2 + $0x68] sm:$0xff] }
   0x6   :  { %250 = vmatpush1.bf16.msra.mxu0 %v827_v2  ;;  %510 = vmatprep.mubr.bf16.mxu1 %v875_v3  ;;  %v832_v11 = vld [vmem:[%s1184_s1 + $0x8] sm:$0xff]   ;;  %v66_v12 = vld [vmem:[%s1185_s2 + $0x50] sm:$0xff]  ;;  %v67_v13 = vld [vmem:[%s1185_s2 + $0x58] sm:$0xff] }
   0x7   :  { %251 = vmatprep.subr.bf16.mxu0 %v828_v4  ;;  %144 = vperm.xlu0 %823, %v70_v7   ;;  %v64_v14 = vld [vmem:[%s1185_s2 + $0x40] sm:$0xff]  ;;  %v65_v15 = vld [vmem:[%s1185_s2 + $0x48] sm:$0xff]  ;;  %v833_v16 = vld [vmem:[%s1184_s1 + $0x10] sm:$0xff]  }
   0x8   :  { %134 = vperm.xlu1 %824, %v68_v8   ;;  %v62_v17 = vld [vmem:[%s1185_s2 + $0x30] sm:$0xff]  ;;  %v63_v18 = vld [vmem:[%s1185_s2 + $0x38] sm:$0xff] }
   0xa   :  { %252 = vmatpush1.bf16.msra.mxu0 %v830_v5 }
   0xb   :  { %149 = vperm.xlu0 %823, %v71_v9  }
   0xc   :  { %139 = vperm.xlu1 %824, %v69_v10  }
   0xd   :  { %804 = vmatmul.mubr.msk.bf16.vlgmr.msra.gmra.mxu0 %vm212_vm0, %v831_v6 }
   0xe   :  { %279 = vmatprep.mubr.bf16.mxu0 %v875_v3 }
   0xf   :  { %124 = vperm.xlu0 %823, %v66_v12  }
  0x10   :  { %129 = vperm.xlu1 %824, %v67_v13  }
  0x13   :  { %114 = vperm.xlu0 %823, %v64_v14  }
  0x14   :  { %119 = vperm.xlu1 %824, %v65_v15  }
  0x15   :  { %805 = vmatmul.mubr.msk.bf16.gmra.mxu0 %vm212_vm0, %v832_v11 }
  0x16   :  { %289 = vmatprep.mubr.bf16.mxu0 %v875_v3 }
  0x17   :  { %104 = vperm.xlu0 %823, %v62_v17  }
  0x18   :  { %16 = vsyncpa [#allocation4], 0  ;;  %109 = vperm.xlu1 %824, %v63_v18   ;;  %v60_v19 = vld [vmem:[%s1185_s2 + $0x20] sm:$0xff]  ;;  %v61_v20 = vld [vmem:[%s1185_s2 + $0x28] sm:$0xff]  ;;  %vm613_vm1 = vcmask 523264  }
  0x19   :  { %v834_v21 = vld [vmem:[%s1184_s1 + $0x18] sm:$0xff]   ;;  %v58_v22 = vld [vmem:[%s1185_s2 + $0x10] sm:$0xff]  ;;  %v56_v24 = vld [vmem:[%s1185_s2] sm:$0xff] }
  0x1a   :  { %v59_v23 = vld [vmem:[%s1185_s2 + $0x18] sm:$0xff]  ;;  %v57_v25 = vld [vmem:[%s1185_s2 + $0x8] sm:$0xff]  ;;  %v835_v26 = vld [vmem:[%s1184_s1 + $0x20] sm:$0xff]  }
  0x1b   :  { %94 = vperm.xlu0 %823, %v60_v19   ;;  %v412_v27 = vld [vmem:[%s1187_s4 + $0x30] sm:$0xff]  ;;  %v413_v28 = vld [vmem:[%s1187_s4 + $0x38] sm:$0xff]  ;;  %v410_v29 = vld [vmem:[%s1187_s4 + $0x20] sm:$0xff] }
  0x1c   :  { %99 = vperm.xlu1 %824, %v61_v20   ;;  %v411_v30 = vld [vmem:[%s1187_s4 + $0x28] sm:$0xff]  ;;  %v408_v32 = vld [vmem:[%s1187_s4 + $0x10] sm:$0xff]  ;;  %v409_v33 = vld [vmem:[%s1187_s4 + $0x18] sm:$0xff] }
  0x1d   :  { %806 = vmatmul.mubr.msk.bf16.gmra.mxu0 %vm212_vm0, %v833_v16  ;;  %v836_v31 = vld [vmem:[%s1184_s1 + $0x28] sm:$0xff]   ;;  %v406_v34 = vld [vmem:[%s1187_s4] sm:$0xff]  ;;  %v837_v36 = vld [vmem:[%s1184_s1 + $0x30] sm:$0xff]  }
  0x1e   :  { %299 = vmatprep.mubr.bf16.mxu0 %v875_v3  ;;  %v407_v35 = vld [vmem:[%s1187_s4 + $0x8] sm:$0xff]  ;;  %v579_v37 = vld [vmem:[%s1189_s6] sm:$0xff]  ;;  %v581_v39 = vld [vmem:[%s1189_s6 + $0x10] sm:$0xff] }
  0x1f   :  { %84 = vperm.xlu0 %823, %v58_v22   ;;  %v580_v38 = vld [vmem:[%s1189_s6 + $0x8] sm:$0xff]  ;;  %v582_v40 = vld [vmem:[%s1189_s6 + $0x18] sm:$0xff]  ;;  %v681_v42 = vld [vmem:[%s1190_s7] sm:$0xff] }
  0x20   :  { %89 = vperm.xlu1 %824, %v59_v23   ;;  %v838_v41 = vld [vmem:[%s1184_s1 + $0x38] sm:$0xff]   ;;  %v682_v43 = vld [vmem:[%s1190_s7 + $0x8] sm:$0xff]  ;;  %v683_v44 = vld [vmem:[%s1190_s7 + $0x10] sm:$0xff] }
  0x21   :  { %v684_v45 = vld [vmem:[%s1190_s7 + $0x18] sm:$0xff]  ;;  %v731_v46 = vld [vmem:[#allocation2] sm:$0x1] }
  0x23   :  { %74 = vperm.xlu0 %823, %v56_v24  }
  0x24   :  { %79 = vperm.xlu1 %824, %v57_v25  }
  0x25   :  { %807 = vmatmul.mubr.msk.bf16.gmra.mxu0 %vm212_vm0, %v834_v21 }
  0x26   :  { %309 = vmatprep.mubr.bf16.mxu0 %v875_v3 }
  0x27   :  { %446 = vperm.xlu0 %823, %v412_v27  }
  0x28   :  { %451 = vperm.xlu1 %824, %v413_v28  }
  0x2b   :  { %436 = vperm.xlu0 %823, %v410_v29  }
  0x2c   :  { %441 = vperm.xlu1 %824, %v411_v30  }
  0x2d   :  { %808 = vmatmul.mubr.msk.bf16.gmra.mxu0 %vm212_vm0, %v835_v26 }
  0x2e   :  { %319 = vmatprep.mubr.bf16.mxu0 %v875_v3 }
  0x2f   :  { %426 = vperm.xlu0 %823, %v408_v32  }
  0x30   :  { %431 = vperm.xlu1 %824, %v409_v33  }
  0x33   :  { %416 = vperm.xlu0 %823, %v406_v34  }
  0x34   :  { %421 = vperm.xlu1 %824, %v407_v35  }
  0x35   :  { %809 = vmatmul.mubr.msk.bf16.gmra.mxu0 %vm212_vm0, %v836_v31 }
  0x36   :  { %329 = vmatprep.mubr.bf16.mxu0 %v875_v3 }
  0x37   :  { %585 = vperm.xlu0 %823, %v579_v37  }
  0x38   :  { %590 = vperm.xlu1 %824, %v580_v38  }
  0x3b   :  { %595 = vperm.xlu0 %823, %v581_v39  }
  0x3c   :  { %600 = vperm.xlu1 %824, %v582_v40  }
  0x3d   :  { %810 = vmatmul.mubr.msk.bf16.gmra.mxu0 %vm212_vm0, %v837_v36 }
  0x3e   :  { %339 = vmatprep.mubr.bf16.mxu0 %v875_v3 }
  0x3f   :  { %687 = vperm.xlu0 %823, %v681_v42  }
  0x40   :  { %692 = vperm.xlu1 %824, %v682_v43  }
  0x43   :  { %697 = vperm.xlu0 %823, %v683_v44  }
  0x44   :  { %702 = vperm.xlu1 %824, %v684_v45  }
  0x45   :  { %811 = vmatmul.mubr.msk.bf16.gmra.mxu0 %vm212_vm0, %v838_v41 }
  0x47   :  { %734 = vperm.xlu0 %823, %v731_v46  }
  0x82   :  { %v1082_v47 = vpop.permute.xlu0 %144 }
  0x83   :  { %v1084_v48 = vpop.permute.xlu1 %134 }
  0x86   :  { %v1086_v49 = vpop.permute.xlu0 %149 }
  0x87   :  { %v1088_v50 = vpop.permute.xlu1 %139 }
  0x8a   :  { %v1090_v51 = vpop.permute.xlu0 %124 }
  0x8b   :  { %v1092_v52 = vpop.permute.xlu1 %129 }
  0x8e   :  { %v1094_v53 = vpop.permute.xlu0 %114 }
  0x8f   :  { %v1096_v54 = vpop.permute.xlu1 %119 }
  0x92   :  { %v1098_v55 = vpop.permute.xlu0 %104 }
  0x93   :  { %v1100_v56 = vpop.permute.xlu1 %109 }
  0x96   :  { %v1102_v57 = vpop.permute.xlu0 %94 }
  0x97   :  { %v1104_v58 = vpop.permute.xlu1 %99 }
  0x9a   :  { %v85_v59 = vpop.permute.xlu0 %84 }
  0x9b   :  { %v90_v60 = vpop.permute.xlu1 %89 }
  0x9e   :  { %v75_v61 = vpop.permute.xlu0 %74 }
  0x9f   :  { %v80_v0 = vpop.permute.xlu1 %79 }
  0xcd   :  { %v271_v62 = vpop.f32.mrf.mxu0 }
  0xce   :  { %v272_v1 = vadd.f32 %v271_v62, %v75_v61 }
  0xcf   :  { %v273_v63 = vpop.f32.mrf.mxu0 }
  0xd0   :  { %v274_v4 = vadd.f32 %v273_v63, %v75_v61  ;;  %v350_v7 = vmax.f32 %v272_v1, 0.0 }
  0xd1   :  { %v275_v2 = vpop.f32.mrf.mxu0 }
  0xd2   :  { %v276_v5 = vadd.f32 %v275_v2, %v80_v0  ;;  %v351_v11 = vmax.f32 %v274_v4, 0.0 }
  0xd3   :  { %v277_v6 = vpop.f32.mrf.mxu0 }
  0xd4   :  { %v352_v8 = vmax.f32 %v276_v5, 0.0  ;;  %v278_v9 = vadd.f32 %v277_v6, %v80_v0 }
  0xd5   :  { %v281_v10 = vpop.f32.mrf.mxu0 }
  0xd6   :  { %v1106_v12 = vpack.c.bf16 %v352_v8, %v350_v7  ;;  %v353_v13 = vmax.f32 %v278_v9, 0.0  ;;  %v282_v16 = vadd.f32 %v281_v10, %v85_v59 }
  0xd7   :  { %v283_v14 = vpop.f32.mrf.mxu0 }
  0xd8   :  { %v1108_v15 = vpack.c.bf16 %v353_v13, %v351_v11  ;;  %v284_v18 = vadd.f32 %v283_v14, %v85_v59  ;;  %v354_v21 = vmax.f32 %v282_v16, 0.0 }
  0xd9   :  { %v285_v17 = vpop.f32.mrf.mxu0 }
  0xda   :  { %v286_v19 = vadd.f32 %v285_v17, %v90_v60  ;;  %v355_v25 = vmax.f32 %v284_v18, 0.0 }
  0xdb   :  { %v287_v20 = vpop.f32.mrf.mxu0 }
  0xdc   :  { %v356_v22 = vmax.f32 %v286_v19, 0.0  ;;  %v288_v23 = vadd.f32 %v287_v20, %v90_v60 }
  0xdd   :  { %v1110_v24 = vpop.f32.mrf.mxu0 }
  0xde   :  { %v1112_v26 = vpack.c.bf16 %v356_v22, %v354_v21  ;;  %v357_v27 = vmax.f32 %v288_v23, 0.0 }
  0xdf   :  { %v1114_v28 = vpop.f32.mrf.mxu0 }
  0xe0   :  { %v1116_v29 = vpack.c.bf16 %v357_v27, %v355_v25 }
  0xe1   :  { %v1118_v30 = vpop.f32.mrf.mxu0 }
  0xe3   :  { %v1120_v31 = vpop.f32.mrf.mxu0 }
  0xe5   :  { %v1122_v32 = vpop.f32.mrf.mxu0 }
  0xe7   :  { %v303_v33 = vpop.f32.mrf.mxu0 }
  0xe9   :  { %v305_v34 = vpop.f32.mrf.mxu0 }
  0xeb   :  { %v307_v35 = vpop.f32.mrf.mxu0 }
  0xed   :  { %v311_v36 = vpop.f32.mrf.mxu0 }
  0xef   :  { %v313_v37 = vpop.f32.mrf.mxu0 }
  0xf1   :  { %v315_v38 = vpop.f32.mrf.mxu0 }
  0xf3   :  { %v317_v39 = vpop.f32.mrf.mxu0 }
  0xf5   :  { %v321_v40 = vpop.f32.mrf.mxu0 }
  0xf6   :  { %v322_v23 = vadd.f32 %v321_v40, %v1090_v51 }
  0xf7   :  { %v323_v41 = vpop.f32.mrf.mxu0 }
  0xf8   :  { %v324_v17 = vadd.f32 %v323_v41, %v1090_v51  ;;  %v316_v41 = vadd.f32 %v315_v38, %v1096_v54  ;;  %v304_v51 = vadd.f32 %v303_v33, %v1098_v55 }
  0xf9   :  { %v325_v42 = vpop.f32.mrf.mxu0 }
  0xfa   :  { %v326_v19 = vadd.f32 %v325_v42, %v1092_v52  ;;  %v371_v27 = vmax.f32 %v324_v17, 0.0  ;;  %v363_v33 = vmax.f32 %v304_v51, 0.0 }
  0xfb   :  { %v327_v43 = vpop.f32.mrf.mxu0 }
  0xfc   :  { %v328_v9 = vadd.f32 %v327_v43, %v1092_v52  ;;  %v372_v43 = vmax.f32 %v326_v19, 0.0  ;;  %v308_v52 = vadd.f32 %v307_v35, %v1100_v56  ;;  %v302_v35 = vadd.f32 %v1122_v32, %v1098_v55 }
  0xfd   :  { %v331_v44 = vpop.f32.mrf.mxu0 }
  0xfe   :  { %v332_v14 = vadd.f32 %v331_v44, %v1084_v48  ;;  %v365_v38 = vmax.f32 %v308_v52, 0.0 }
  0xff   :  { %v333_v45 = vpop.f32.mrf.mxu0 }
 0x100   :  { %v334_v5 = vadd.f32 %v333_v45, %v1084_v48  ;;  %v374_v25 = vmax.f32 %v332_v14, 0.0  ;;  %v314_v48 = vadd.f32 %v313_v37, %v1094_v53  ;;  %v306_v37 = vadd.f32 %v305_v34, %v1100_v56  ;;  %v447_v14 = vpop.permute.xlu0 %446 }
 0x101   :  { %v335_v46 = vpop.f32.mrf.mxu0  ;;  %v296_v56 = vadd.f32 %v1118_v30, %v1104_v58 }
 0x102   :  { %v336_v7 = vadd.f32 %v335_v46, %v1088_v50  ;;  %v375_v18 = vmax.f32 %v334_v5, 0.0  ;;  %v370_v46 = vmax.f32 %v322_v23, 0.0  ;;  %v367_v40 = vmax.f32 %v314_v48, 0.0 }
 0x103   :  { %v337_v59 = vpop.f32.mrf.mxu0  ;;  %v364_v34 = vmax.f32 %v306_v37, 0.0  ;;  %v360_v32 = vmax.f32 %v296_v56, 0.0 }
 0x104   :  { %v338_v63 = vadd.f32 %v337_v59, %v1088_v50  ;;  %v376_v20 = vmax.f32 %v336_v7, 0.0  ;;  %v373_v50 = vmax.f32 %v328_v9, 0.0  ;;  %v368_v59 = vmax.f32 %v316_v41, 0.0  ;;  %v437_v19 = vpop.permute.xlu0 %436 }
 0x105   :  { %v341_v60 = vpop.f32.mrf.mxu0 }
 0x106   :  { %v342_v2 = vadd.f32 %v341_v60, %v1082_v47  ;;  %v377_v10 = vmax.f32 %v338_v63, 0.0  ;;  %v402_v44 = vpack.c.bf16 %v376_v20, %v374_v25  ;;  %v401_v45 = vpack.c.bf16 %v373_v50, %v371_v27 }
 0x107   :  { %v343_v61 = vpop.f32.mrf.mxu0  ;;  %v400_v60 = vpack.c.bf16 %v372_v43, %v370_v46 }
 0x108   :  { %v344_v0 = vadd.f32 %v343_v61, %v1082_v47  ;;  %v378_v16 = vmax.f32 %v342_v2, 0.0  ;;  %v403_v22 = vpack.c.bf16 %v377_v10, %v375_v18  ;;  %v427_v43 = vpop.permute.xlu0 %426 }
 0x109   :  { %v345_v62 = vpop.f32.mrf.mxu0 }
 0x10a   :  { %v346_v1 = vadd.f32 %v345_v62, %v1086_v49  ;;  %v379_v11 = vmax.f32 %v344_v0, 0.0  ;;  %v397_v0 = vpack.c.bf16 %v365_v38, %v363_v33 }
 0x10b   :  { %v347_v4 = vpop.f32.mrf.mxu0 }
 0x10c   :  { %v348_v6 = vadd.f32 %v347_v4, %v1086_v49  ;;  %v380_v8 = vmax.f32 %v346_v1, 0.0  ;;  %v318_v49 = vadd.f32 %v317_v39, %v1096_v54  ;;  %v312_v39 = vadd.f32 %v311_v36, %v1094_v53  ;;  %v417_v56 = vpop.permute.xlu0 %416 }
 0x10d   :  { %v298_v54 = vadd.f32 %v1120_v31, %v1104_v58  ;;  %v294_v53 = vadd.f32 %v1114_v28, %v1102_v57  ;;  %v292_v31 = vadd.f32 %v1110_v24, %v1102_v57  ;;  %v362_v1 = vmax.f32 %v302_v35, 0.0  ;;  %v839_v57 = vld [vmem:[%s1186_s3] sm:$0xff]   ;;  %v840_v58 = vld [vmem:[%s1186_s3 + $0x8] sm:$0xff]  }
 0x10e   :  { %v381_v13 = vmax.f32 %v348_v6, 0.0  ;;  %v404_v21 = vpack.c.bf16 %v380_v8, %v378_v16  ;;  %v369_v42 = vmax.f32 %v318_v49, 0.0  ;;  %v366_v62 = vmax.f32 %v312_v39, 0.0 }
 0x10f   :  { %v361_v63 = vmax.f32 %v298_v54, 0.0  ;;  %v359_v55 = vmax.f32 %v294_v53, 0.0  ;;  %v396_v2 = vpack.c.bf16 %v364_v34, %v362_v1  ;;  %v358_v28 = vmax.f32 %v292_v31, 0.0 }
 0x110   :  { %v405_v47 = vpack.c.bf16 %v381_v13, %v379_v11  ;;  %v399_v61 = vpack.c.bf16 %v369_v42, %v367_v40  ;;  %v398_v36 = vpack.c.bf16 %v368_v59, %v366_v62  ;;  %v452_v11 = vpop.permute.xlu1 %451 }
 0x111   :  { %v395_v4 = vpack.c.bf16 %v361_v63, %v359_v55  ;;  %v394_v5 = vpack.c.bf16 %v360_v32, %v358_v28 }
 0x112   :  { %478 = vmatprep.subr.bf16.mxu1 %v405_v47 }
 0x113   :  { %479 = vmatpush1.bf16.msra.mxu1 %v404_v21 }
 0x114   :  { %480 = vmatprep.subr.bf16.mxu1 %v403_v22  ;;  %v442_v18 = vpop.permute.xlu1 %441 }
 0x117   :  { %481 = vmatpush1.bf16.msra.mxu1 %v402_v44 }
 0x118   :  { %482 = vmatprep.subr.bf16.mxu1 %v401_v45  ;;  %v432_v23 = vpop.permute.xlu1 %431 }
 0x11b   :  { %483 = vmatpush1.bf16.msra.mxu1 %v400_v60 }
 0x11c   :  { %484 = vmatprep.subr.bf16.mxu1 %v399_v61  ;;  %v422_v54 = vpop.permute.xlu1 %421 }
 0x11f   :  { %485 = vmatpush1.bf16.msra.mxu1 %v398_v36 }
 0x120   :  { %486 = vmatprep.subr.bf16.mxu1 %v397_v0 }
 0x123   :  { %487 = vmatpush1.bf16.msra.mxu1 %v396_v2 }
 0x124   :  { %488 = vmatprep.subr.bf16.mxu1 %v395_v4 }
 0x127   :  { %489 = vmatpush1.bf16.msra.mxu1 %v394_v5 }
 0x128   :  { %490 = vmatprep.subr.bf16.mxu1 %v1116_v29 }
 0x12b   :  { %491 = vmatpush1.bf16.msra.mxu1 %v1112_v26 }
 0x12c   :  { %492 = vmatprep.subr.bf16.mxu1 %v1108_v15  ;;  %v841_v15 = vld [vmem:[%s1186_s3 + $0x10] sm:$0xff]  }
 0x12f   :  { %493 = vmatpush1.bf16.msra.mxu1 %v1106_v12  ;;  %v842_v12 = vld [vmem:[%s1186_s3 + $0x18] sm:$0xff]  }
 0x132   :  { %511 = vmatmul.mubr.bf16.vlgmr.msra.gmra.mxu1 %v839_v57 }
 0x133   :  { %520 = vmatprep.mubr.bf16.mxu1 %v875_v3 }
 0x13a   :  { %521 = vmatmul.mubr.bf16.gmra.mxu1 %v840_v58 }
 0x13b   :  { %530 = vmatprep.mubr.bf16.mxu1 %v875_v3 }
 0x142   :  { %531 = vmatmul.mubr.bf16.gmra.mxu1 %v841_v15 }
 0x143   :  { %540 = vmatprep.mubr.bf16.mxu1 %v875_v3 }
 0x14a   :  { %541 = vmatmul.mubr.bf16.gmra.mxu1 %v842_v12 }
 0x14b   :  { %652 = vmatprep.mubr.bf16.mxu1 %v875_v3 }
 0x1f2   :  { %v512_v24 = vpop.f32.mrf.mxu1 }
 0x1f3   :  { %v513_v4 = vadd.f32 %v512_v24, %v417_v56  ;;  %v844_v24 = vld [vmem:[%s1188_s5 + $0x8] sm:$0xff]  }
 0x1f4   :  { %v514_v26 = vpop.f32.mrf.mxu1 }
 0x1f5   :  { %v515_v63 = vadd.f32 %v514_v26, %v417_v56  ;;  %v551_v12 = vmax.f32 %v513_v4, 0.0  ;;  %v843_v26 = vld [vmem:[%s1188_s5] sm:$0xff]   ;;  %s877_s5 = smov [#allocation3]  }
 0x1f6   :  { %v516_v29 = vpop.f32.mrf.mxu1  ;;  %s784_s12 = sshll.u32 %s877_s5, 4  ;;  %s785_s12 = int_to_ptr.vmem [resolvable:$true] %s784_s12 }
 0x1f7   :  { %v517_v31 = vadd.f32 %v516_v29, %v422_v54  ;;  %v552_v5 = vmax.f32 %v515_v63, 0.0  ;;  %v586_v29 = vpop.permute.xlu0 %585  ;;  %s853_s13 = scalar_lea.vmem %s785_s12, 32  ;;  %p858_p1 = scmp.lt.s32.totalorder %s785_s12, %s785_s12 }
 0x1f8   :  { %v518_v30 = vpop.f32.mrf.mxu1  ;;  %p854_p0 = scmp.ne.s32.totalorder %s785_s12, %s853_s13  ;;  %p859_p2 = scmp.lt.s32.totalorder %s853_s13, %s853_s13 }
 0x1f9   :  { %v519_v62 = vadd.f32 %v518_v30, %v422_v54  ;;  %v553_v57 = vmax.f32 %v517_v31, 0.0 }
 0x1fa   :  { %v522_v6 = vpop.f32.mrf.mxu1  ;;  %p860_p3 = por %p859_p2, %p858_p1 }
 0x1fb   :  { %v523_v34 = vadd.f32 %v522_v6, %v427_v43  ;;  %v554_v32 = vmax.f32 %v519_v62, 0.0  ;;  %v571_v30 = vpack.c.bf16 %v553_v57, %v551_v12  ;;  %v591_v6 = vpop.permute.xlu1 %590 }
 0x1fc   :  { %v524_v7 = vpop.f32.mrf.mxu1  ;;  %p861_p4 = pnand %p860_p3, %p854_p0 }
 0x1fd   :  { %v525_v37 = vadd.f32 %v524_v7, %v427_v43  ;;  %v555_v28 = vmax.f32 %v523_v34, 0.0  ;;  %v572_v15 = vpack.c.bf16 %v554_v32, %v552_v5  ;;  %v596_v7 = vpop.permute.xlu0 %595 }
 0x1fe   :  { %v526_v8 = vpop.f32.mrf.mxu1 }
 0x1ff   :  { %v527_v38 = vadd.f32 %v526_v8, %v432_v23  ;;  %v556_v0 = vmax.f32 %v525_v37, 0.0 }
 0x200   :  { %v528_v9 = vpop.f32.mrf.mxu1 }
 0x201   :  { %v529_v42 = vadd.f32 %v528_v9, %v432_v23  ;;  %v557_v1 = vmax.f32 %v527_v38, 0.0 }
 0x202   :  { %v532_v10 = vpop.f32.mrf.mxu1 }
 0x203   :  { %v533_v51 = vadd.f32 %v532_v10, %v437_v19  ;;  %v558_v53 = vmax.f32 %v529_v42, 0.0  ;;  %v573_v58 = vpack.c.bf16 %v557_v1, %v555_v28  ;;  %v601_v10 = vpop.permute.xlu1 %600 }
 0x204   :  { %v534_v13 = vpop.f32.mrf.mxu1 }
 0x205   :  { %v535_v27 = vadd.f32 %v534_v13, %v437_v19  ;;  %v559_v36 = vmax.f32 %v533_v51, 0.0  ;;  %v574_v2 = vpack.c.bf16 %v558_v53, %v556_v0  ;;  %v737_v53 = vlaneseq }
 0x206   :  { %v536_v16 = vpop.f32.mrf.mxu1 }
 0x207   :  { %v537_v44 = vadd.f32 %v536_v16, %v442_v18  ;;  %v560_v59 = vmax.f32 %v535_v27, 0.0  ;;  %v688_v16 = vpop.permute.xlu0 %687  ;;  %v738_v0 = vshrl.u32 %v737_v53, 7  ;;  %vm775_vm2 = vcmp.lt.s32.totalorder %v737_v53, 256 }
 0x208   :  { %v538_v17 = vpop.f32.mrf.mxu1 }
 0x209   :  { %v539_v49 = vadd.f32 %v538_v17, %v442_v18  ;;  %v561_v61 = vmax.f32 %v537_v44, 0.0 }
 0x20a   :  { %v542_v47 = vpop.f32.mrf.mxu1 }
 0x20b   :  { %v543_v25 = vadd.f32 %v542_v47, %v447_v14  ;;  %v562_v45 = vmax.f32 %v539_v49, 0.0  ;;  %v575_v55 = vpack.c.bf16 %v561_v61, %v559_v36 }
 0x20c   :  { %v544_v20 = vpop.f32.mrf.mxu1 }
 0x20d   :  { %v545_v50 = vadd.f32 %v544_v20, %v447_v14  ;;  %v563_v40 = vmax.f32 %v543_v25, 0.0  ;;  %v576_v33 = vpack.c.bf16 %v562_v45, %v560_v59 }
 0x20e   :  { %v546_v21 = vpop.f32.mrf.mxu1 }
 0x20f   :  { %v547_v22 = vadd.f32 %v546_v21, %v452_v11  ;;  %v564_v39 = vmax.f32 %v545_v50, 0.0  ;;  %v693_v50 = vpop.permute.xlu1 %692 }
 0x210   :  { %v548_v48 = vpop.f32.mrf.mxu1 }
 0x211   :  { %v549_v41 = vadd.f32 %v548_v48, %v452_v11  ;;  %v565_v52 = vmax.f32 %v547_v22, 0.0 }
 0x213   :  { %v566_v46 = vmax.f32 %v549_v41, 0.0  ;;  %v577_v35 = vpack.c.bf16 %v565_v52, %v563_v40  ;;  %v698_v41 = vpop.permute.xlu0 %697  ;;  %v703_v54 = vpop.permute.xlu1 %702 }
 0x215   :  { %v578_v60 = vpack.c.bf16 %v566_v46, %v564_v39 }
 0x217   :  { %628 = vmatprep.subr.bf16.mxu1 %v578_v60  ;;  %v735_v5 = vpop.permute.xlu0 %734 }
 0x218   :  { %629 = vmatpush1.bf16.msra.mxu1 %v577_v35 }
 0x219   :  { %630 = vmatprep.subr.bf16.mxu1 %v576_v33 }
 0x21c   :  { %631 = vmatpush1.bf16.msra.mxu1 %v575_v55 }
 0x21d   :  { %632 = vmatprep.subr.bf16.mxu1 %v574_v2  ;;  %v739_v2 = vsub.s32 0, %v738_v0 }
 0x220   :  { %633 = vmatpush1.bf16.msra.mxu1 %v573_v58 }
 0x221   :  { %634 = vmatprep.subr.bf16.mxu1 %v572_v15  ;;  %v740_v15 = vrot.slane %v735_v5, %v739_v2 }
 0x224   :  { %635 = vmatpush1.bf16.msra.mxu1 %v571_v30 }
 0x227   :  { %818 = vmatmul.mubr.msk.bf16.vlgmr.msra.gmra.mxu1 %vm613_vm1, %v843_v26 }
 0x228   :  { %662 = vmatprep.mubr.bf16.mxu1 %v875_v3 }
 0x22f   :  { %819 = vmatmul.mubr.msk.bf16.gmra.mxu1 %vm613_vm1, %v844_v24 }
 0x2e7   :  { %v654_v8 = vpop.f32.mrf.mxu1 }
 0x2e8   :  { %v655_v11 = vadd.f32 %v654_v8, %v586_v29 }
 0x2e9   :  { %v656_v9 = vpop.f32.mrf.mxu1 }
 0x2ea   :  { %v657_v17 = vadd.f32 %v656_v9, %v586_v29  ;;  %v673_v3 = vmax.f32 %v655_v11, 0.0 }
 0x2eb   :  { %v658_v13 = vpop.f32.mrf.mxu1 }
 0x2ec   :  { %v659_v14 = vadd.f32 %v658_v13, %v591_v6  ;;  %v674_v22 = vmax.f32 %v657_v17, 0.0  ;;  %v705_v43 = vmul.f32 %v688_v16, %v673_v3 }
 0x2ed   :  { %v660_v18 = vpop.f32.mrf.mxu1 }
 0x2ee   :  { %v675_v47 = vmax.f32 %v659_v14, 0.0  ;;  %v661_v19 = vadd.f32 %v660_v18, %v591_v6  ;;  %v706_v46 = vmul.f32 %v688_v16, %v674_v22  ;;  %v876_v16 = vmov 1966171168  }
 0x2ef   :  { %v664_v20 = vpop.f32.mrf.mxu1  ;;  %v759_v17 = vunpack.c.l.s4 %v876_v16 }
 0x2f0   :  { %v676_v21 = vmax.f32 %v661_v19, 0.0  ;;  %v665_v49 = vadd.f32 %v664_v20, %v596_v7  ;;  %v707_v25 = vmul.f32 %v693_v50, %v675_v47 }
 0x2f1   :  { %v666_v23 = vpop.f32.mrf.mxu1  ;;  %v760_v18 = vunpack.c.0.s8 %v759_v17 }
 0x2f2   :  { %v677_v48 = vmax.f32 %v665_v49, 0.0  ;;  %v667_v27 = vadd.f32 %v666_v23, %v596_v7  ;;  %v708_v52 = vmul.f32 %v693_v50, %v676_v21  ;;  %v713_v40 = vadd.f32 %v707_v25, %v705_v43 }
 0x2f3   :  { %v668_v44 = vpop.f32.mrf.mxu1  ;;  %v763_v21 = vsub.s32 %v760_v18, %v738_v0 }
 0x2f4   :  { %v709_v42 = vmul.f32 %v698_v41, %v677_v48  ;;  %v678_v45 = vmax.f32 %v667_v27, 0.0  ;;  %v669_v39 = vadd.f32 %v668_v44, %v601_v10  ;;  %v722_v38 = vadd.f32 %v708_v52, %v706_v46 }
 0x2f5   :  { %v670_v51 = vpop.f32.mrf.mxu1 }
 0x2f6   :  { %v710_v37 = vmul.f32 %v698_v41, %v678_v45  ;;  %v679_v59 = vmax.f32 %v669_v39, 0.0  ;;  %v671_v60 = vadd.f32 %v670_v51, %v601_v10  ;;  %v714_v61 = vadd.f32 %v713_v40, %v709_v42 }
 0x2f8   :  { %v711_v35 = vmul.f32 %v703_v54, %v679_v59  ;;  %v680_v62 = vmax.f32 %v671_v60, 0.0  ;;  %v723_v33 = vadd.f32 %v722_v38, %v710_v37 }
 0x2fa   :  { %v715_v56 = vadd.f32 %v714_v61, %v711_v35  ;;  %v712_v34 = vmul.f32 %v703_v54, %v680_v62 }
 0x2fc   :  { %v716_v36 = vrot.slane %v715_v56, 4  ;;  %v724_v63 = vadd.f32 %v723_v33, %v712_v34 }
 0x2fe   :  { %v717_v31 = vadd.f32 %v716_v36, %v715_v56  ;;  %v725_v1 = vrot.slane %v724_v63, 4 }
 0x300   :  { %v718_v55 = vrot.slane %v717_v31, 2  ;;  %v726_v32 = vadd.f32 %v725_v1, %v724_v63 }
 0x302   :  { %v719_v4 = vadd.f32 %v718_v55, %v717_v31  ;;  %v727_v28 = vrot.slane %v726_v32, 2 }
 0x304   :  { %v720_v57 = vrot.slane %v719_v4, 1  ;;  %v728_v58 = vadd.f32 %v727_v28, %v726_v32 }
 0x306   :  { %v721_v12 = vadd.f32 %v720_v57, %v719_v4  ;;  %v729_v30 = vrot.slane %v728_v58, 1 }
 0x308   :  { %v741_v26 = vadd.f32 %v740_v15, %v721_v12  ;;  %v730_v24 = vadd.f32 %v729_v30, %v728_v58 }
 0x30a   :  { %v743_v29 = vsub.f32 0.0, %v741_v26  ;;  %v742_v6 = vadd.f32 %v740_v15, %v730_v24 }
 0x30c   :  { %v745_v7 = vmul.f32 1.442695, %v743_v29  ;;  %v744_v8 = vsub.f32 0.0, %v742_v6 }
 0x30e   :  { %845 = vpow2.f32 %v745_v7  ;;  %v747_v9 = vmul.f32 1.442695, %v744_v8 }
 0x310   :  { %847 = vpow2.f32 %v747_v9 }
 0x31b   :  { %v846_v10 = vpop.eup %845 }
 0x31c   :  { %v749_v11 = vadd.f32 1.0, %v846_v10 }
 0x31d   :  { %v848_v13 = vpop.eup %847 }
 0x31e   :  { %v750_v14 = vadd.f32 1.0, %v848_v13  ;;  %849 = vrcp.f32 %v749_v11 }
 0x320   :  { %851 = vrcp.f32 %v750_v14 }
 0x32b   :  { %v850_v47 = vpop.eup %849 }
 0x32c   :  { %v753_v3 = vmul.f32 0.5, %v850_v47 }
 0x32d   :  { %v852_v19 = vpop.eup %851 }
 0x32e   :  { %v754_v20 = vmul.f32 0.5, %v852_v19 }
 0x330   :  { %v757_v49 = vcombine.low %v753_v3, %v754_v20 }
 0x332   :  { %v764_v50 = vrot.slane %v757_v49, %v763_v21 }
 0x334   :  { %v771_v22 = vrot.slane %v764_v50, %v763_v21 }
 0x336   :  { %777 = vst.msk [vmem:[#allocation3] sm:$0x3] %vm775_vm2, %v771_v22 }
 0x337   :  { %864 = shalt.err (!%p861_p4)
}
 0x338   :  { %787 = dma.vmem_to_hbm [thread:$0]  %s785_s12, 32, %s1192_s9, [#allocation4]  }
 0x339   :  { %873 = dma.done.wait [#allocation4], 32  }
 0x33a   :  { %874 = vsyncadd [#allocation4], 4294967264 }
 0x33b   :  { %791 = vsyncpa [#allocation4], 1 }

</bundles_post_ra>
